<compile_context>
chip_gen: v6e
topology: v6e:2x2x1
jax: 0.10.0
libtpu: 0.0.40
codegen_flags: <defaults>
</compile_context>

<pallas_src>
import functools

import jax
import jax.numpy as jnp
from jax.experimental import pallas as pl
from jax.experimental.pallas import tpu as pltpu


def _loss_kernel(pred_ref, mask_ref, regr_ref, out_ref, *, n_regr):
    """Per-(batch, row-tile) partial reductions.

    pred_ref : (1, C, T, 128)   (C = 1 logit plane + n_regr regr planes)
    mask_ref : (1, T, 128)
    regr_ref : (1, n_regr, T, 128)
    out_ref  : (1, 8, 128) f32 -- sublane 0: lane0=ml_sum, lane1=regr_num,
               lane2=mask_sum; everything else zero.
    """
    m = mask_ref[0].astype(jnp.float32)        # (T, 128)
    p0 = pred_ref[0, 0].astype(jnp.float32)    # mask-logit plane

    # --- mask (BCE-style) term via log-sigmoid identity -------------------
    #   m*log(sig(p0)) + (1-m)*log(1-sig(p0)) = m*p0 - softplus(p0)
    softplus = jnp.maximum(p0, 0.0) + jnp.log1p(jnp.exp(-jnp.abs(p0)))
    ml_sum = jnp.sum(m * p0 - softplus)

    # --- masked L1 regression term, one channel plane at a time -----------
    # Static Python loop (n_regr is compile-time); scalar accumulation keeps
    # only ~3 planes live at once.
    regr_num = jnp.float32(0.0)
    for c in range(n_regr):
        pc = pred_ref[0, c + 1].astype(jnp.float32)
        rc = regr_ref[0, c].astype(jnp.float32)
        regr_num = regr_num + jnp.sum(jnp.abs(pc - rc) * m)

    mask_sum = jnp.sum(m)

    # Pack the three partial scalars into (sublane 0, lanes 0/1/2) of a full
    # (8, 128) tile -- unmasked, lane-dense store.
    lane = jax.lax.broadcasted_iota(jnp.int32, out_ref.shape, dimension=2)
    sub = jax.lax.broadcasted_iota(jnp.int32, out_ref.shape, dimension=1)
    vals = (jnp.where(lane == 0, ml_sum, 0.0)
            + jnp.where(lane == 1, regr_num, 0.0)
            + jnp.where(lane == 2, mask_sum, 0.0))
    out_ref[...] = jnp.where(sub == 0, vals, 0.0)


def _choose_row_tile(rows_raw, n_planes, dtype_bytes):
    """Row-tile T: bounded double-buffered footprint (~8 MiB), multiple of 8."""
    budget = 8 << 20
    t = budget // (2 * n_planes * 128 * max(int(dtype_bytes), 1))
    t = int(max(8, min(512, t)))
    t -= t % 8
    rows_min = ((rows_raw + 7) // 8) * 8
    return max(8, min(t, rows_min))


def custom_loss(prediction, mask, regr, weight=0.4, size_average=False,
                eps=1e-12):
    """JAX/Pallas port of CustomLoss.forward. Returns (loss, mask_loss, regr_loss).

    `eps` is kept for interface parity; the kernel uses the numerically stable
    log-sigmoid form, which matches the eps-clamped reference to O(eps) for
    non-saturated logits (for |logit| >> -log(eps) the kernel keeps the exact
    BCE instead of the reference's log(eps) clamp).
    """
    B, C, H, W = prediction.shape
    R = C - 1
    assert regr.shape == (B, R, H, W)
    assert mask.shape == (B, H, W)
    del eps

    # ---- lane-dense flattened layout with padding to full tiles ----------
    S = H * W
    rows_raw = -(-S // 128)
    T = _choose_row_tile(rows_raw, C + R + 1, prediction.dtype.itemsize)
    n_tiles = -(-rows_raw // T)
    rows = n_tiles * T
    S_pad = rows * 128

    pred_flat = prediction.reshape(B, C, S)
    mask_flat = mask.reshape(B, S)
    regr_flat = regr.reshape(B, R, S)
    if S_pad != S:
        pad = S_pad - S
        # Padded pixels: mask=0 kills the regr term and mask_sum; logit=-30
        # makes the BCE term -softplus(-30) ~ 1e-13 per pixel (negligible).
        pred_flat = jnp.pad(pred_flat, ((0, 0), (0, 0), (0, pad)),
                            constant_values=-30.0)
        mask_flat = jnp.pad(mask_flat, ((0, 0), (0, pad)),
                            constant_values=0.0)
        regr_flat = jnp.pad(regr_flat, ((0, 0), (0, 0), (0, pad)),
                            constant_values=0.0)
    pred2 = pred_flat.reshape(B, C, rows, 128)
    mask2 = mask_flat.reshape(B, rows, 128)
    regr2 = regr_flat.reshape(B, R, rows, 128)

    bytes_accessed = (pred2.size * pred2.dtype.itemsize
                      + mask2.size * mask2.dtype.itemsize
                      + regr2.size * regr2.dtype.itemsize
                      + B * n_tiles * 8 * 128 * 4)
    cost = pl.CostEstimate(
        flops=int(4 * B * S_pad * (R + 2)),
        transcendentals=int(2 * B * S_pad),
        bytes_accessed=int(bytes_accessed),
    )

    acc = pl.pallas_call(
        functools.partial(_loss_kernel, n_regr=R),
        out_shape=jax.ShapeDtypeStruct((B, n_tiles * 8, 128), jnp.float32),
        grid=(B, n_tiles),
        in_specs=[
            pl.BlockSpec((1, C, T, 128), lambda b, t: (b, 0, t, 0)),
            pl.BlockSpec((1, T, 128), lambda b, t: (b, t, 0)),
            pl.BlockSpec((1, R, T, 128), lambda b, t: (b, 0, t, 0)),
        ],
        out_specs=pl.BlockSpec((1, 8, 128), lambda b, t: (b, t, 0)),
        compiler_params=pltpu.CompilerParams(
            dimension_semantics=("parallel", "parallel")),
        cost_estimate=cost,
    )(pred2, mask2, regr2)

    # Sum per-tile partials (non-written sublanes are zero).
    ml_sum = jnp.sum(acc[:, :, 0], axis=1)     # (B,)
    regr_num = jnp.sum(acc[:, :, 1], axis=1)   # (B,)
    mask_sum = jnp.sum(acc[:, :, 2], axis=1)   # (B,)

    b_f = jnp.float32(B)
    mask_loss = -(jnp.sum(ml_sum) / b_f)                 # -mean(0).sum()
    # NOTE: like the reference, an all-zero mask for a batch element yields
    # inf/nan here (division by zero) -- semantics intentionally preserved.
    regr_loss = jnp.mean(regr_num / mask_sum)            # per-batch ratio, mean
    loss = weight * mask_loss + (1.0 - weight) * regr_loss
    if not size_average:
        loss = loss * b_f
    return loss, mask_loss, regr_loss


def _reference(prediction, mask, regr, weight=0.4, size_average=False,
               eps=1e-12):
    pred_mask = jax.nn.sigmoid(prediction[:, 0])
    ml = mask * jnp.log(pred_mask + eps) + (1 - mask) * jnp.log(1 - pred_mask + eps)
    mask_loss = -jnp.sum(jnp.mean(ml, axis=0))
    pred_regr = prediction[:, 1:]
    num = jnp.sum(jnp.sum(jnp.sum(jnp.abs(pred_regr - regr), axis=1) * mask,
                          axis=1), axis=1)
    den = jnp.sum(jnp.sum(mask, axis=1), axis=1)
    regr_loss = jnp.mean(num / den, axis=0)
    loss = weight * mask_loss + (1 - weight) * regr_loss
    if not size_average:
        loss = loss * prediction.shape[0]
    return loss, mask_loss, regr_loss


if __name__ == "__main__":
    B, R, H, W = 2, 7, 16, 16
    C = R + 1

    key = jax.random.PRNGKey(0)
    k1, k2, k3 = jax.random.split(key, 3)
    prediction = jax.random.normal(k1, (B, C, H, W), dtype=jnp.float32)
    mask = (jax.random.uniform(k2, (B, H, W)) > 0.5).astype(jnp.float32)
    regr = jax.random.normal(k3, (B, R, H, W), dtype=jnp.float32)

    out = custom_loss(prediction, mask, regr, weight=0.4, size_average=False)
    out = jax.block_until_ready(out)

    ref = _reference(prediction, mask, regr, weight=0.4, size_average=False)
    for a, b in zip(out, ref):
        assert jnp.allclose(a, b, rtol=1e-4, atol=1e-4), (a, b)

    print("KERNEL_OK")
</pallas_src>

<mosaic_0001>
module attributes {stable_mosaic.version = 11 : i64} {
  func.func @_loss_kernel(%arg0: i32, %arg1: i32, %arg2: memref<1x8x8x128xf32, #tpu.memory_space<vmem>>, %arg3: memref<1x8x128xf32, #tpu.memory_space<vmem>>, %arg4: memref<1x7x8x128xf32, #tpu.memory_space<vmem>>, %arg5: memref<1x8x128xf32, #tpu.memory_space<vmem>>) attributes {dimension_semantics = [#tpu.dimension_semantics<parallel>, #tpu.dimension_semantics<parallel>], iteration_bounds = array<i64: 2, 1>, scalar_prefetch = 0 : i64, scratch_operands = 0 : i64, tpu.core_type = #tpu.core_type<tc>, window_params = [{transform_indices = @transform_0, window_bounds = array<i64: 1, 8, 8, 128>}, {transform_indices = @transform_1, window_bounds = array<i64: 1, 8, 128>}, {transform_indices = @transform_2, window_bounds = array<i64: 1, 7, 8, 128>}, {transform_indices = @transform_3, window_bounds = array<i64: 1, 8, 128>}]} {
    %c0 = arith.constant 0 : index
    %c0_0 = arith.constant 0 : index
    %c0_1 = arith.constant 0 : index
    %0 = vector.load %arg3[%c0, %c0_0, %c0_1] : memref<1x8x128xf32, #tpu.memory_space<vmem>>, vector<1x8x128xf32>
    %1 = vector.shape_cast %0 : vector<1x8x128xf32> to vector<8x128xf32>
    %c0_2 = arith.constant 0 : index
    %c0_3 = arith.constant 0 : index
    %c0_4 = arith.constant 0 : index
    %c0_5 = arith.constant 0 : index
    %2 = vector.load %arg2[%c0_2, %c0_3, %c0_4, %c0_5] : memref<1x8x8x128xf32, #tpu.memory_space<vmem>>, vector<1x1x8x128xf32>
    %3 = vector.shape_cast %2 : vector<1x1x8x128xf32> to vector<8x128xf32>
    %cst = arith.constant 0.000000e+00 : f32
    %4 = vector.broadcast %cst : f32 to vector<8x128xf32>
    %5 = arith.maximumf %3, %4 : vector<8x128xf32>
    %6 = math.absf %3 : vector<8x128xf32>
    %cst_6 = arith.constant 0.000000e+00 : f32
    %7 = vector.broadcast %cst_6 : f32 to vector<8x128xf32>
    %8 = arith.subf %7, %6 : vector<8x128xf32>
    %9 = math.exp %8 : vector<8x128xf32>
    %10 = math.log1p %9 : vector<8x128xf32>
    %11 = arith.addf %5, %10 : vector<8x128xf32>
    %12 = arith.mulf %1, %3 : vector<8x128xf32>
    %13 = arith.subf %12, %11 : vector<8x128xf32>
    %14 = vector.shape_cast %13 : vector<8x128xf32> to vector<1x8x128xf32>
    %cst_7 = arith.constant dense<0.000000e+00> : vector<1xf32>
    %15 = vector.multi_reduction <add>, %14, %cst_7 [1, 2] : vector<1x8x128xf32> to vector<1xf32>
    %16 = vector.shape_cast %15 : vector<1xf32> to vector<1x1x1xf32>
    %17 = vector.extract %16[0, 0, 0] : f32 from vector<1x1x1xf32>
    %c0_8 = arith.constant 0 : index
    %c1 = arith.constant 1 : index
    %c0_9 = arith.constant 0 : index
    %c0_10 = arith.constant 0 : index
    %18 = vector.load %arg2[%c0_8, %c1, %c0_9, %c0_10] : memref<1x8x8x128xf32, #tpu.memory_space<vmem>>, vector<1x1x8x128xf32>
    %19 = vector.shape_cast %18 : vector<1x1x8x128xf32> to vector<8x128xf32>
    %c0_11 = arith.constant 0 : index
    %c0_12 = arith.constant 0 : index
    %c0_13 = arith.constant 0 : index
    %c0_14 = arith.constant 0 : index
    %20 = vector.load %arg4[%c0_11, %c0_12, %c0_13, %c0_14] : memref<1x7x8x128xf32, #tpu.memory_space<vmem>>, vector<1x1x8x128xf32>
    %21 = vector.shape_cast %20 : vector<1x1x8x128xf32> to vector<8x128xf32>
    %22 = arith.subf %19, %21 : vector<8x128xf32>
    %23 = math.absf %22 : vector<8x128xf32>
    %24 = arith.mulf %23, %1 : vector<8x128xf32>
    %25 = vector.shape_cast %24 : vector<8x128xf32> to vector<1x8x128xf32>
    %cst_15 = arith.constant dense<0.000000e+00> : vector<1xf32>
    %26 = vector.multi_reduction <add>, %25, %cst_15 [1, 2] : vector<1x8x128xf32> to vector<1xf32>
    %27 = vector.shape_cast %26 : vector<1xf32> to vector<1x1x1xf32>
    %28 = vector.extract %27[0, 0, 0] : f32 from vector<1x1x1xf32>
    %cst_16 = arith.constant 0.000000e+00 : f32
    %29 = arith.addf %cst_16, %28 : f32
    %c0_17 = arith.constant 0 : index
    %c2 = arith.constant 2 : index
    %c0_18 = arith.constant 0 : index
    %c0_19 = arith.constant 0 : index
    %30 = vector.load %arg2[%c0_17, %c2, %c0_18, %c0_19] : memref<1x8x8x128xf32, #tpu.memory_space<vmem>>, vector<1x1x8x128xf32>
    %31 = vector.shape_cast %30 : vector<1x1x8x128xf32> to vector<8x128xf32>
    %c0_20 = arith.constant 0 : index
    %c1_21 = arith.constant 1 : index
    %c0_22 = arith.constant 0 : index
    %c0_23 = arith.constant 0 : index
    %32 = vector.load %arg4[%c0_20, %c1_21, %c0_22, %c0_23] : memref<1x7x8x128xf32, #tpu.memory_space<vmem>>, vector<1x1x8x128xf32>
    %33 = vector.shape_cast %32 : vector<1x1x8x128xf32> to vector<8x128xf32>
    %34 = arith.subf %31, %33 : vector<8x128xf32>
    %35 = math.absf %34 : vector<8x128xf32>
    %36 = arith.mulf %35, %1 : vector<8x128xf32>
    %37 = vector.shape_cast %36 : vector<8x128xf32> to vector<1x8x128xf32>
    %cst_24 = arith.constant dense<0.000000e+00> : vector<1xf32>
    %38 = vector.multi_reduction <add>, %37, %cst_24 [1, 2] : vector<1x8x128xf32> to vector<1xf32>
    %39 = vector.shape_cast %38 : vector<1xf32> to vector<1x1x1xf32>
    %40 = vector.extract %39[0, 0, 0] : f32 from vector<1x1x1xf32>
    %41 = arith.addf %29, %40 : f32
    %c0_25 = arith.constant 0 : index
    %c3 = arith.constant 3 : index
    %c0_26 = arith.constant 0 : index
    %c0_27 = arith.constant 0 : index
    %42 = vector.load %arg2[%c0_25, %c3, %c0_26, %c0_27] : memref<1x8x8x128xf32, #tpu.memory_space<vmem>>, vector<1x1x8x128xf32>
    %43 = vector.shape_cast %42 : vector<1x1x8x128xf32> to vector<8x128xf32>
    %c0_28 = arith.constant 0 : index
    %c2_29 = arith.constant 2 : index
    %c0_30 = arith.constant 0 : index
    %c0_31 = arith.constant 0 : index
    %44 = vector.load %arg4[%c0_28, %c2_29, %c0_30, %c0_31] : memref<1x7x8x128xf32, #tpu.memory_space<vmem>>, vector<1x1x8x128xf32>
    %45 = vector.shape_cast %44 : vector<1x1x8x128xf32> to vector<8x128xf32>
    %46 = arith.subf %43, %45 : vector<8x128xf32>
    %47 = math.absf %46 : vector<8x128xf32>
    %48 = arith.mulf %47, %1 : vector<8x128xf32>
    %49 = vector.shape_cast %48 : vector<8x128xf32> to vector<1x8x128xf32>
    %cst_32 = arith.constant dense<0.000000e+00> : vector<1xf32>
    %50 = vector.multi_reduction <add>, %49, %cst_32 [1, 2] : vector<1x8x128xf32> to vector<1xf32>
    %51 = vector.shape_cast %50 : vector<1xf32> to vector<1x1x1xf32>
    %52 = vector.extract %51[0, 0, 0] : f32 from vector<1x1x1xf32>
    %53 = arith.addf %41, %52 : f32
    %c0_33 = arith.constant 0 : index
    %c4 = arith.constant 4 : index
    %c0_34 = arith.constant 0 : index
    %c0_35 = arith.constant 0 : index
    %54 = vector.load %arg2[%c0_33, %c4, %c0_34, %c0_35] : memref<1x8x8x128xf32, #tpu.memory_space<vmem>>, vector<1x1x8x128xf32>
    %55 = vector.shape_cast %54 : vector<1x1x8x128xf32> to vector<8x128xf32>
    %c0_36 = arith.constant 0 : index
    %c3_37 = arith.constant 3 : index
    %c0_38 = arith.constant 0 : index
    %c0_39 = arith.constant 0 : index
    %56 = vector.load %arg4[%c0_36, %c3_37, %c0_38, %c0_39] : memref<1x7x8x128xf32, #tpu.memory_space<vmem>>, vector<1x1x8x128xf32>
    %57 = vector.shape_cast %56 : vector<1x1x8x128xf32> to vector<8x128xf32>
    %58 = arith.subf %55, %57 : vector<8x128xf32>
    %59 = math.absf %58 : vector<8x128xf32>
    %60 = arith.mulf %59, %1 : vector<8x128xf32>
    %61 = vector.shape_cast %60 : vector<8x128xf32> to vector<1x8x128xf32>
    %cst_40 = arith.constant dense<0.000000e+00> : vector<1xf32>
    %62 = vector.multi_reduction <add>, %61, %cst_40 [1, 2] : vector<1x8x128xf32> to vector<1xf32>
    %63 = vector.shape_cast %62 : vector<1xf32> to vector<1x1x1xf32>
    %64 = vector.extract %63[0, 0, 0] : f32 from vector<1x1x1xf32>
    %65 = arith.addf %53, %64 : f32
    %c0_41 = arith.constant 0 : index
    %c5 = arith.constant 5 : index
    %c0_42 = arith.constant 0 : index
    %c0_43 = arith.constant 0 : index
    %66 = vector.load %arg2[%c0_41, %c5, %c0_42, %c0_43] : memref<1x8x8x128xf32, #tpu.memory_space<vmem>>, vector<1x1x8x128xf32>
    %67 = vector.shape_cast %66 : vector<1x1x8x128xf32> to vector<8x128xf32>
    %c0_44 = arith.constant 0 : index
    %c4_45 = arith.constant 4 : index
    %c0_46 = arith.constant 0 : index
    %c0_47 = arith.constant 0 : index
    %68 = vector.load %arg4[%c0_44, %c4_45, %c0_46, %c0_47] : memref<1x7x8x128xf32, #tpu.memory_space<vmem>>, vector<1x1x8x128xf32>
    %69 = vector.shape_cast %68 : vector<1x1x8x128xf32> to vector<8x128xf32>
    %70 = arith.subf %67, %69 : vector<8x128xf32>
    %71 = math.absf %70 : vector<8x128xf32>
    %72 = arith.mulf %71, %1 : vector<8x128xf32>
    %73 = vector.shape_cast %72 : vector<8x128xf32> to vector<1x8x128xf32>
    %cst_48 = arith.constant dense<0.000000e+00> : vector<1xf32>
    %74 = vector.multi_reduction <add>, %73, %cst_48 [1, 2] : vector<1x8x128xf32> to vector<1xf32>
    %75 = vector.shape_cast %74 : vector<1xf32> to vector<1x1x1xf32>
    %76 = vector.extract %75[0, 0, 0] : f32 from vector<1x1x1xf32>
    %77 = arith.addf %65, %76 : f32
    %c0_49 = arith.constant 0 : index
    %c6 = arith.constant 6 : index
    %c0_50 = arith.constant 0 : index
    %c0_51 = arith.constant 0 : index
    %78 = vector.load %arg2[%c0_49, %c6, %c0_50, %c0_51] : memref<1x8x8x128xf32, #tpu.memory_space<vmem>>, vector<1x1x8x128xf32>
    %79 = vector.shape_cast %78 : vector<1x1x8x128xf32> to vector<8x128xf32>
    %c0_52 = arith.constant 0 : index
    %c5_53 = arith.constant 5 : index
    %c0_54 = arith.constant 0 : index
    %c0_55 = arith.constant 0 : index
    %80 = vector.load %arg4[%c0_52, %c5_53, %c0_54, %c0_55] : memref<1x7x8x128xf32, #tpu.memory_space<vmem>>, vector<1x1x8x128xf32>
    %81 = vector.shape_cast %80 : vector<1x1x8x128xf32> to vector<8x128xf32>
    %82 = arith.subf %79, %81 : vector<8x128xf32>
    %83 = math.absf %82 : vector<8x128xf32>
    %84 = arith.mulf %83, %1 : vector<8x128xf32>
    %85 = vector.shape_cast %84 : vector<8x128xf32> to vector<1x8x128xf32>
    %cst_56 = arith.constant dense<0.000000e+00> : vector<1xf32>
    %86 = vector.multi_reduction <add>, %85, %cst_56 [1, 2] : vector<1x8x128xf32> to vector<1xf32>
    %87 = vector.shape_cast %86 : vector<1xf32> to vector<1x1x1xf32>
    %88 = vector.extract %87[0, 0, 0] : f32 from vector<1x1x1xf32>
    %89 = arith.addf %77, %88 : f32
    %c0_57 = arith.constant 0 : index
    %c7 = arith.constant 7 : index
    %c0_58 = arith.constant 0 : index
    %c0_59 = arith.constant 0 : index
    %90 = vector.load %arg2[%c0_57, %c7, %c0_58, %c0_59] : memref<1x8x8x128xf32, #tpu.memory_space<vmem>>, vector<1x1x8x128xf32>
    %91 = vector.shape_cast %90 : vector<1x1x8x128xf32> to vector<8x128xf32>
    %c0_60 = arith.constant 0 : index
    %c6_61 = arith.constant 6 : index
    %c0_62 = arith.constant 0 : index
    %c0_63 = arith.constant 0 : index
    %92 = vector.load %arg4[%c0_60, %c6_61, %c0_62, %c0_63] : memref<1x7x8x128xf32, #tpu.memory_space<vmem>>, vector<1x1x8x128xf32>
    %93 = vector.shape_cast %92 : vector<1x1x8x128xf32> to vector<8x128xf32>
    %94 = arith.subf %91, %93 : vector<8x128xf32>
    %95 = math.absf %94 : vector<8x128xf32>
    %96 = arith.mulf %95, %1 : vector<8x128xf32>
    %97 = vector.shape_cast %96 : vector<8x128xf32> to vector<1x8x128xf32>
    %cst_64 = arith.constant dense<0.000000e+00> : vector<1xf32>
    %98 = vector.multi_reduction <add>, %97, %cst_64 [1, 2] : vector<1x8x128xf32> to vector<1xf32>
    %99 = vector.shape_cast %98 : vector<1xf32> to vector<1x1x1xf32>
    %100 = vector.extract %99[0, 0, 0] : f32 from vector<1x1x1xf32>
    %101 = arith.addf %89, %100 : f32
    %102 = vector.shape_cast %1 : vector<8x128xf32> to vector<1x8x128xf32>
    %cst_65 = arith.constant dense<0.000000e+00> : vector<1xf32>
    %103 = vector.multi_reduction <add>, %102, %cst_65 [1, 2] : vector<1x8x128xf32> to vector<1xf32>
    %104 = vector.shape_cast %103 : vector<1xf32> to vector<1x1x1xf32>
    %105 = vector.extract %104[0, 0, 0] : f32 from vector<1x1x1xf32>
    %106 = tpu.iota {dimensions = array<i32: 2>} : vector<1x8x128xi32>
    %107 = tpu.iota {dimensions = array<i32: 1>} : vector<1x8x128xi32>
    %c0_i32 = arith.constant 0 : i32
    %108 = vector.broadcast %c0_i32 : i32 to vector<1x8x128xi32>
    %109 = arith.cmpi eq, %106, %108 : vector<1x8x128xi32>
    %cst_66 = arith.constant 0.000000e+00 : f32
    %110 = vector.broadcast %17 : f32 to vector<1x8x128xf32>
    %111 = vector.broadcast %cst_66 : f32 to vector<1x8x128xf32>
    %112 = arith.select %109, %110, %111 : vector<1x8x128xi1>, vector<1x8x128xf32>
    %c1_i32 = arith.constant 1 : i32
    %113 = vector.broadcast %c1_i32 : i32 to vector<1x8x128xi32>
    %114 = arith.cmpi eq, %106, %113 : vector<1x8x128xi32>
    %cst_67 = arith.constant 0.000000e+00 : f32
    %115 = vector.broadcast %101 : f32 to vector<1x8x128xf32>
    %116 = vector.broadcast %cst_67 : f32 to vector<1x8x128xf32>
    %117 = arith.select %114, %115, %116 : vector<1x8x128xi1>, vector<1x8x128xf32>
    %118 = arith.addf %112, %117 : vector<1x8x128xf32>
    %c2_i32 = arith.constant 2 : i32
    %119 = vector.broadcast %c2_i32 : i32 to vector<1x8x128xi32>
    %120 = arith.cmpi eq, %106, %119 : vector<1x8x128xi32>
    %cst_68 = arith.constant 0.000000e+00 : f32
    %121 = vector.broadcast %105 : f32 to vector<1x8x128xf32>
    %122 = vector.broadcast %cst_68 : f32 to vector<1x8x128xf32>
    %123 = arith.select %120, %121, %122 : vector<1x8x128xi1>, vector<1x8x128xf32>
    %124 = arith.addf %118, %123 : vector<1x8x128xf32>
    %c0_i32_69 = arith.constant 0 : i32
    %125 = vector.broadcast %c0_i32_69 : i32 to vector<1x8x128xi32>
    %126 = arith.cmpi eq, %107, %125 : vector<1x8x128xi32>
    %cst_70 = arith.constant 0.000000e+00 : f32
    %127 = vector.broadcast %cst_70 : f32 to vector<1x8x128xf32>
    %128 = arith.select %126, %124, %127 : vector<1x8x128xi1>, vector<1x8x128xf32>
    %c0_71 = arith.constant 0 : index
    %c0_72 = arith.constant 0 : index
    %c0_73 = arith.constant 0 : index
    %129 = vector.load %arg5[%c0_71, %c0_72, %c0_73] : memref<1x8x128xf32, #tpu.memory_space<vmem>>, vector<1x8x128xf32>
    tpu.vector_store %arg5[%c0_71, %c0_72, %c0_73], %128 {strides = array<i32>} : memref<1x8x128xf32, #tpu.memory_space<vmem>>, vector<1x8x128xf32>,
    return
  }
  func.func @transform_0(%arg0: i32, %arg1: i32) -> (i32, i32, i32, i32) {
    %c0_i32 = arith.constant 0 : i32
    %c0_i32_0 = arith.constant 0 : i32
    %c0_i32_1 = arith.constant 0 : i32
    return %arg0, %c0_i32, %arg1, %c0_i32_0 : i32, i32, i32, i32
  }
  func.func @transform_1(%arg0: i32, %arg1: i32) -> (i32, i32, i32) {
    %c0_i32 = arith.constant 0 : i32
    %c0_i32_0 = arith.constant 0 : i32
    return %arg0, %arg1, %c0_i32 : i32, i32, i32
  }
  func.func @transform_2(%arg0: i32, %arg1: i32) -> (i32, i32, i32, i32) {
    %c0_i32 = arith.constant 0 : i32
    %c0_i32_0 = arith.constant 0 : i32
    %c0_i32_1 = arith.constant 0 : i32
    return %arg0, %c0_i32, %arg1, %c0_i32_0 : i32, i32, i32, i32
  }
  func.func @transform_3(%arg0: i32, %arg1: i32) -> (i32, i32, i32) {
    %c0_i32 = arith.constant 0 : i32
    %c0_i32_0 = arith.constant 0 : i32
    return %arg0, %arg1, %c0_i32 : i32, i32, i32
  }
}

</mosaic_0001>

<bundles_post_ra>
// kernel: tpu_custom_call.1
= control target key start
LH: loop header
LB: loop body
LE: loop exit
PB: predicated region body
PF: predicated region fallthrough
CT: control target
= control target key end

     0   :  { %s1151_s0 = inlined_call_operand.hbm [shape: f32[2,8,8,128], index: 0, kind: input, shape index: {}]   ;;  %s1152_s1 = inlined_call_operand.hbm [shape: f32[2,8,128], index: 1, kind: input, shape index: {}]   ;;  %s1153_s2 = inlined_call_operand.hbm [shape: f32[2,7,8,128], index: 2, kind: input, shape index: {}]   ;;  %s1154_s3 = inlined_call_operand.hbm [shape: f32[2,8,128], index: 3, kind: output, shape index: {}]  }
   0x1   :  { %1157 = sst [smem:[#allocation15_spill]] %s1151_s0 }
   0x2   :  { %1158 = sst [smem:[#allocation16_spill]] %s1152_s1 }
   0x3   :  { %8 = vsyncpa [#allocation3], 0 }
   0x4   :  { %10 = vsyncpa [#allocation3 + $0x1], 0 }
   0x5   :  { %11 = vsyncpa [#allocation6], 0 }
   0x6   :  { %13 = vsyncpa [#allocation6 + $0x1], 0 }
   0x7   :  { %14 = vsyncpa [#allocation4], 0 }
   0x8   :  { %16 = vsyncpa [#allocation4 + $0x1], 0  ;;  %s928_s12 = smov 0   ;;  %s930_s13 = smov 0  }
   0x9   :  { %s932_s14 = smov 0   ;;  %s934_s15 = smov 0  }
   0xa   :  { %s936_s16 = smov 0   ;;  %s938_s17 = smov 0  }
   0xb LB: > { %1159 = sst [smem:[#allocation12_spill]] %s888_s14  ;;  %s959_s18 = sadd.s32 4294967295, %s900_s17   ;;  %s900_s17 = sphi %s938_s17, %s22_s17   ;;  %s896_s16 = sphi %s936_s16, %s1177_s16   ;;  %s892_s15 = sphi %s934_s15, %s1176_s15   ;;  %s888_s14 = sphi %s932_s14, %s1172_s14   ;;  %s884_s13 = sphi %s930_s13, %s1175_s13   ;;  %s880_s12 = sphi %s928_s12, %s1174_s12  }
   0xc   : > { %s602_s19 = sadd.s32 4294967294, %s900_s17   ;;  %s34_s20 = sadd.s32 1, %s896_s16 }
   0xd   : > { %s43_s21 = sadd.s32 1, %s888_s14  ;;  %p36_p0 = scmp.ge.s32.totalorder %s34_s20, 2 }
   0xe   : > { %p50_p1 = scmp.ne.s32.totalorder %s888_s14, %s884_s13  ;;  %p51_p2 = scmp.eq.s32.totalorder %s900_s17, 0 }
   0xf   : > { %p56_p3 = scmp.ne.s32.totalorder %s884_s13, %s880_s12  ;;  %s1179_s20 = smov (%p36_p0, %s34_s20), 0 }
  0x10   : > { %1160 = sst [smem:[#allocation13_spill]] %s1179_s20  ;;  %p971_p4 = por %p51_p2, %p50_p1 }
  0x11   : > { %p57_p5 = scmp.eq.s32.totalorder %s959_s18, 0  ;;  %s38_s23 = ssub.s32 %s896_s16, %s1179_s20 }
  0x12   : > { %p138_p6 = scmp.eq.s32.totalorder %s959_s18, 1  ;;  %p41_p7 = scmp.eq.s32.totalorder %s38_s23, 0 }
  0x13   : > { %p979_p8 = por %p57_p5, %p56_p3  ;;  %p144_p10 = scmp.eq.s32.totalorder %s602_s19, 1 }
  0x14   : > { %p983_p9 = por %p138_p6, %p50_p1  ;;  %p604_p12 = scmp.ge.s32.totalorder %s900_s17, 2 }
  0x15   : > { %s988_s26 = scalar_select %p41_p7, %s888_s14, %s43_s21  }
  0x16   : > { %p990_p11 = por %p144_p10, %p56_p3  ;;  %p676_p13 = scmp.lt.s32.totalorder %s900_s17, 2 }
  0x17   : > { %1164 = sst [smem:[#allocation14_spill]] %s988_s26  ;;  %s997_s28 = sand.u32 1, %s888_s14  }
  0x18   : > { %s186_s29 = sand.u32 1, %s900_s17   ;;  %s608_s30 = sshll.u32 %s997_s28, 3 }
  0x19   : > { %p1003_p0 = pnand %p676_p13, %p971_p4  ;;  %s609_s5 = sshll.u32 %s896_s16, 7 }
  0x1a   : > { %s1167_s1 = sld [smem:[#allocation16_spill]]  ;;  %s190_s9 = scalar_lea.vmem [#allocation5], %s608_s30 }
  0x1b   : > { %s198_s10 = sshll.u32 %s190_s9, 4  ;;  %p611_p1 = scmp.ge.s32.totalorder %s900_s17, 1  ;;  %s199_s10 = int_to_ptr.vmem [resolvable:$true] %s198_s10 }
  0x1c   : > { %s1013_s19 = scalar_lea.sflag [#allocation6], %s186_s29  ;;  %p734_p2 = pneg %p1003_p0 }
  0x1d   : > { %s745_s21 = scalar_lea.vmem %s199_s10, 128  ;;  %s902_s22 = smov [#allocation5]  }
  0x1e   : > { %p746_p3 = scmp.ne.s32.totalorder %s199_s10, %s745_s21  ;;  %s750_s23 = sshll.u32 %s902_s22, 4  ;;  %s751_s23 = int_to_ptr.vmem [resolvable:$false] %s750_s23 }
  0x1f   : > { %s752_s6 = scalar_lea.vmem %s751_s23, 256  ;;  %p753_p6 = scmp.lt.s32.totalorder %s199_s10, %s751_s23 }
  0x20   : > { %s196_s8 = scalar_lea.hbm %s1167_s1, %s609_s5  ;;  %p748_p4 = pnand %p746_p3, %p734_p2 }
  0x21   : > { %p754_p7 = scmp.lt.s32.totalorder %s752_s6, %s745_s21 }
  0x22   : > { %p749_p5 = pneg %p748_p4 }
  0x23   : > { %p755_p10 = por %p754_p7, %p753_p6 }
  0x25   : > { %p756_p13 = pnand %p755_p10, %p749_p5 }
  0x27   : > { %759 = shalt.err (!%p756_p13)
}
  0x28   : > { %668 = dma.hbm_to_vmem [thread:$0]  (!%p1003_p0), %s196_s8, 128, %s199_s10, %s1013_s19  }
  0x29   : > { %p225_p3 = scmp.lt.s32.totalorder %s900_s17, 3  ;;  %s605_s30 = sshll.u32 %s997_s28, 6 }
  0x2a   : > { %s632_s5 = sshll.u32 %s896_s16, 10  ;;  %s1169_s0 = sld [smem:[#allocation15_spill]] }
  0x2b   : > { %p1026_p4 = pnand %p611_p1, %p225_p3  ;;  %s168_s22 = scalar_lea.vmem [#allocation2], %s605_s30 }
  0x2c   : > { %s176_s23 = sshll.u32 %s168_s22, 4  ;;  %s165_s6 = scalar_lea.sflag [#allocation3], %s997_s28  ;;  %s177_s23 = int_to_ptr.vmem [resolvable:$true] %s176_s23 }
  0x2d   : > { %s773_s11 = scalar_lea.vmem %s177_s23, 1024  ;;  %s903_s8 = smov [#allocation2]  }
  0x2e   : > { %p774_p5 = scmp.ne.s32.totalorder %s177_s23, %s773_s11  ;;  %s778_s10 = sshll.u32 %s903_s8, 4  ;;  %s779_s10 = int_to_ptr.vmem [resolvable:$false] %s778_s10 }
  0x2f   : > { %s780_s1 = scalar_lea.vmem %s779_s10, 2048  ;;  %p781_p1 = scmp.lt.s32.totalorder %s177_s23, %s779_s10 }
  0x30   : > { %s175_s21 = scalar_lea.hbm %s1169_s0, %s632_s5  ;;  %p776_p6 = pnand %p774_p5, %p734_p2 }
  0x31   : > { %p782_p10 = scmp.lt.s32.totalorder %s780_s1, %s773_s11 }
  0x32   : > { %p777_p7 = pneg %p776_p6 }
  0x33   : > { %p783_p13 = por %p782_p10, %p781_p1 }
  0x35   : > { %p784_p3 = pnand %p783_p13, %p777_p7 }
  0x37   : > { %787 = shalt.err (!%p784_p3)
}
  0x38   : > { %s904_s5 = smov 128   ;;  %s905_s30 = smov 8  }
  0x39   : > { %665 = dma.hbm_to_vmem [thread:$0]  (!%p1003_p0), %s175_s21, 1024, %s177_s23, %s165_s6, %s904_s5, %s904_s5, %s905_s30  }
  0x3a   : > { %s634_s7 = smul.u32 896, %s896_s16  ;;  %s906_s10 = smov [#allocation7]  }
  0x3b   : > { %s1170_s9 = smul.u32 56, %s997_s28  ;;  %s806_s26 = sshll.u32 %s906_s10, 4  ;;  %s807_s26 = int_to_ptr.vmem [resolvable:$false] %s806_s26 }
  0x3c   : > { %s216_s1 = scalar_lea.hbm %s1153_s2, %s634_s7  ;;  %s808_s14 = scalar_lea.vmem %s807_s26, 1792 }
  0x3d   : > { %s209_s22 = scalar_lea.vmem [#allocation7], %s1170_s9 }
  0x3e   : > { %s217_s0 = sshll.u32 %s209_s22, 4  ;;  %s218_s0 = int_to_ptr.vmem [resolvable:$true] %s217_s0 }
  0x3f   : > { %s801_s11 = scalar_lea.vmem %s218_s0, 896  ;;  %p809_p1 = scmp.lt.s32.totalorder %s218_s0, %s807_s26 }
  0x40   : > { %p802_p5 = scmp.ne.s32.totalorder %s218_s0, %s801_s11  ;;  %p810_p10 = scmp.lt.s32.totalorder %s808_s14, %s801_s11 }
  0x42   : > { %p804_p6 = pnand %p802_p5, %p734_p2  ;;  %p811_p13 = por %p810_p10, %p809_p1 }
  0x44   : > { %p805_p7 = pneg %p804_p6 }
  0x46   : > { %p812_p3 = pnand %p811_p13, %p805_p7 }
  0x48   : > { %815 = shalt.err (!%p812_p3)
}
  0x49   : > { %671 = dma.hbm_to_vmem [thread:$0]  (!%p1003_p0), %s216_s1, 896, %s218_s0, %s1013_s19, %s904_s5, %s904_s5, %s905_s30  }
  0x4a   : > { %229 = sbr.rel (%p1026_p4) target bundleno = 363 (0x16b), region = 32  ;;  %s1056_s20 = sand.u32 (!%p1026_p4), 1, %s884_s13  }
  0x4b   : > { %s612_s28 = sshll.u32 (!%p1026_p4), %s1056_s20, 6  ;;  %s232_s21 = scalar_lea.sflag (!%p1026_p4), [#allocation3], %s1056_s20 }
  0x4c   : > { %s1060_s26 = scalar_lea.vmem (!%p1026_p4), [#allocation2], %s612_s28 }
  0x4f   : > { %867 = dma.done.wait (%p979_p8), %s232_s21, 1024  }
  0x50   : > { %869 = vsyncadd (%p979_p8), %s232_s21, 4294966272  ;;  %s240_s0 = sand.u32 1, %s959_s18   ;;  %s613_s14 = sshll.u32 %s1056_s20, 3 }
  0x51   : > { %s241_s4 = scalar_lea.sflag [#allocation6], %s240_s0  ;;  %s244_s19 = scalar_lea.vmem [#allocation5], %s613_s14 }
  0x52   : > { %871 = dma.done.wait (%p979_p8), %s241_s4, 1024  }
  0x53   : > { %873 = vsyncadd (%p979_p8), %s241_s4, 4294966272  ;;  %s635_s29 = smul.u32 56, %s1056_s20  ;;  %v1075_v0 = vld [vmem:[%s244_s19] sm:$0xff]  ;;  %v616_v4 = vld [vmem:[%s1060_s26 + $0x10] sm:$0xff]  ;;  %s629_s0 = sshll.u32 %s892_s15, 7 }
  0x54   : > { %v615_v1 = vld [vmem:[%s1060_s26 + $0x8] sm:$0xff]  ;;  %v618_v6 = vld [vmem:[%s1060_s26 + $0x18] sm:$0xff]  ;;  %v287_v13 = vld [vmem:[%s1060_s26] sm:$0xff]  ;;  %s285_s4 = scalar_lea.vmem [#allocation8], %s613_s14  ;;  %s907_s15 = smov [#allocation8]  }
  0x55   : > { %s1078_s18 = scalar_lea.vmem [#allocation7], %s635_s29  ;;  %v622_v9 = vld [vmem:[%s1060_s26 + $0x28] sm:$0xff]  ;;  %v289_v16 = vand.u32 2147483647, %v287_v13  ;;  %v626_v19 = vld [vmem:[%s1060_s26 + $0x38] sm:$0xff]  ;;  %v620_v35 = vld [vmem:[%s1060_s26 + $0x20] sm:$0xff]  ;;  %v303_v44 = vmul.f32 %v287_v13, %v1075_v0 }
  0x56   : > { %v316_v2 = vld [vmem:[%s1078_s18] sm:$0xff]  ;;  %v617_v5 = vld [vmem:[%s1078_s18 + $0x8] sm:$0xff]  ;;  %v619_v8 = vld [vmem:[%s1078_s18 + $0x10] sm:$0xff]  ;;  %v288_v39 = vmax.f32 %v287_v13, 0.0  ;;  %s474_s19 = sshll.u32 %s285_s4, 4  ;;  %s820_s14 = sshll.u32 %s907_s15, 4  ;;  %s475_s19 = int_to_ptr.vmem [resolvable:$true] %s474_s19  ;;  %s821_s14 = int_to_ptr.vmem [resolvable:$false] %s820_s14 }
  0x57   : > { %v317_v3 = vsub.f32 %v615_v1, %v316_v2  ;;  %v334_v7 = vsub.f32 %v616_v4, %v617_v5  ;;  %v623_v10 = vld [vmem:[%s1078_s18 + $0x20] sm:$0xff]  ;;  %v351_v12 = vsub.f32 %v618_v6, %v619_v8  ;;  %v627_v20 = vld [vmem:[%s1078_s18 + $0x30] sm:$0xff]  ;;  %v290_v22 = vsub.f32 0.0, %v289_v16  ;;  %v621_v36 = vld [vmem:[%s1078_s18 + $0x18] sm:$0xff]  ;;  %p823_p4 = scmp.lt.s32.totalorder %s475_s19, %s821_s14 }
  0x58   : > { %v385_v15 = vsub.f32 %v622_v9, %v623_v10  ;;  %v419_v26 = vsub.f32 %v626_v19, %v627_v20  ;;  %v368_v40 = vsub.f32 %v620_v35, %v621_v36  ;;  %v624_v42 = vld [vmem:[%s1060_s26 + $0x30] sm:$0xff] }
  0x59   : > { %v318_v11 = vand.u32 2147483647, %v317_v3  ;;  %v335_v14 = vand.u32 2147483647, %v334_v7  ;;  %v352_v18 = vand.u32 2147483647, %v351_v12 }
  0x5a   : > { %v386_v24 = vand.u32 2147483647, %v385_v15  ;;  %v291_v25 = vmul.f32 1.442695, %v290_v22  ;;  %v420_v28 = vand.u32 2147483647, %v419_v26 }
  0x5b   : > { %v319_v17 = vmul.f32 %v318_v11, %v1075_v0  ;;  %v336_v21 = vmul.f32 %v335_v14, %v1075_v0  ;;  %v353_v23 = vmul.f32 %v352_v18, %v1075_v0  ;;  %v625_v43 = vld [vmem:[%s1078_s18 + $0x28] sm:$0xff]  ;;  %v369_v47 = vand.u32 2147483647, %v368_v40 }
  0x5c   : > { %728 = vpow2.f32 %v291_v25  ;;  %v387_v27 = vmul.f32 %v386_v24, %v1075_v0  ;;  %v421_v29 = vmul.f32 %v420_v28, %v1075_v0  ;;  %v402_v48 = vsub.f32 %v624_v42, %v625_v43 }
  0x5d   : > { %320 = vadd.xlane.f32.xlu0 %v319_v17  ;;  %337 = vadd.xlane.f32.xlu1 %v336_v21  ;;  %v370_v50 = vmul.f32 %v369_v47, %v1075_v0 }
  0x5e   : > { %v403_v51 = vand.u32 2147483647, %v402_v48 }
  0x60   : > { %v404_v52 = vmul.f32 %v403_v51, %v1075_v0 }
  0x61   : > { %354 = vadd.xlane.f32.xlu1 %v353_v23 }
  0x65   : > { %388 = vadd.xlane.f32.xlu1 %v387_v27 }
  0x69   : > { %422 = vadd.xlane.f32.xlu1 %v421_v29  ;;  %v729_v30 = vpop.eup %728 }
  0x6a   : > { %v293_v31 = vadd.f32 1.0, %v729_v30  ;;  %v296_v32 = vmul.f32 -0.5, %v729_v30  ;;  %v299_v34 = vand.u32 2147483647, %v729_v30 }
  0x6c   : > { %730 = vlog2.f32 %v293_v31  ;;  %v297_v33 = vadd.f32 1.0, %v296_v32  ;;  %vm300_vm0 = vcmp.lt.f32.partialorder %v299_v34, 0.0004427343 }
  0x6e   : > { %v298_v37 = vmul.f32 %v729_v30, %v297_v33 }
  0x79   : > { %v731_v38 = vpop.eup %730 }
  0x7a   : > { %v295_v41 = vmul.f32 0.6931472, %v731_v38 }
  0x7c   : > { %v301_v45 = vsel %vm300_vm0, %v298_v37, %v295_v41 }
  0x7d   : > { %v302_v46 = vadd.f32 %v301_v45, %v288_v39 }
  0x7f   : > { %v304_v49 = vsub.f32 %v303_v44, %v302_v46 }
  0x81   : > { %305 = vadd.xlane.f32.xlu0 %v304_v49 }
  0x85   : > { %371 = vadd.xlane.f32.xlu0 %v370_v50 }
  0x89   : > { %405 = vadd.xlane.f32.xlu0 %v404_v52  ;;  %v441_v52 = vlaneseq }
  0x8d   : > { %432 = vadd.xlane.f32.xlu0 %v1075_v0 }
  0xe6   : > { %v338_v53 = vpop.xlane.xlu1 %337  ;;  %v321_v55 = vpop.xlane.xlu0 %320 }
  0xe7   : > { %v322_v57 = vrot.slane %v321_v55, 4  ;;  %v339_v58 = vrot.slane %v338_v53, 4 }
  0xe9   : > { %v323_v60 = vadd.f32 %v322_v57, %v321_v55  ;;  %v340_v62 = vadd.f32 %v339_v58, %v338_v53  ;;  %v442_v53 = vand.u32 127, %v441_v52  ;;  %v444_v55 = vshrl.u32 %v441_v52, 7 }
  0xea   : > { %v355_v54 = vpop.xlane.xlu1 %354 }
  0xeb   : > { %v356_v59 = vrot.slane %v355_v54, 4  ;;  %v324_v2 = vrot.slane %v323_v60, 2  ;;  %v341_v6 = vrot.slane %v340_v62, 2  ;;  %vm445_vm1 = vcmp.eq.s32.totalorder %v442_v53, 0 }
  0xec   : > { %vm448_vm2 = vcmp.eq.s32.totalorder %v442_v53, 1  ;;  %vm452_vm3 = vcmp.eq.s32.totalorder %v442_v53, 2  ;;  %vm456_vm4 = vcmp.eq.s32.totalorder %v444_v55, 0 }
  0xed   : > { %v357_v1 = vadd.f32 %v356_v59, %v355_v54  ;;  %v325_v12 = vadd.f32 %v324_v2, %v323_v60  ;;  %v342_v15 = vadd.f32 %v341_v6, %v340_v62 }
  0xee   : > { %v389_v56 = vpop.xlane.xlu1 %388 }
  0xef   : > { %v390_v61 = vrot.slane %v389_v56, 4  ;;  %v358_v8 = vrot.slane %v357_v1, 2  ;;  %v326_v21 = vrot.slane %v325_v12, 1  ;;  %v343_v26 = vrot.slane %v342_v15, 1 }
  0xf1   : > { %v391_v3 = vadd.f32 %v390_v61, %v389_v56  ;;  %v359_v16 = vadd.f32 %v358_v8, %v357_v1  ;;  %v327_v33 = vadd.f32 %v326_v21, %v325_v12  ;;  %v344_v37 = vadd.f32 %v343_v26, %v342_v15 }
  0xf2   : > { %v423_v63 = vpop.xlane.xlu1 %422 }
  0xf3   : > { %v424_v5 = vrot.slane %v423_v63, 4  ;;  %v392_v9 = vrot.slane %v391_v3, 2  ;;  %v360_v27 = vrot.slane %v359_v16, 1 }
  0xf5   : > { %v425_v10 = vadd.f32 %v424_v5, %v423_v63  ;;  %v393_v22 = vadd.f32 %v392_v9, %v391_v3  ;;  %v361_v39 = vadd.f32 %v360_v27, %v359_v16 }
  0xf7   : > { %v426_v19 = vrot.slane %v425_v10, 2  ;;  %v394_v34 = vrot.slane %v393_v22, 1 }
  0xf9   : > { %v427_v31 = vadd.f32 %v426_v19, %v425_v10  ;;  %v395_v43 = vadd.f32 %v394_v34, %v393_v22 }
  0xfb   : > { %v428_v44 = vrot.slane %v427_v31, 1 }
  0xfd   : > { %v429_v49 = vadd.f32 %v428_v44, %v427_v31 }
 0x10a   : > { %v306_v4 = vpop.xlane.xlu0 %305 }
 0x10b   : > { %v307_v7 = vrot.slane %v306_v4, 4 }
 0x10d   : > { %v308_v0 = vadd.f32 %v307_v7, %v306_v4 }
 0x10e   : > { %v372_v11 = vpop.xlane.xlu0 %371 }
 0x10f   : > { %v309_v13 = vrot.slane %v308_v0, 2  ;;  %v373_v14 = vrot.slane %v372_v11, 4 }
 0x111   : > { %v374_v17 = vadd.f32 %v373_v14, %v372_v11  ;;  %v310_v18 = vadd.f32 %v309_v13, %v308_v0 }
 0x112   : > { %v406_v20 = vpop.xlane.xlu0 %405 }
 0x113   : > { %v375_v23 = vrot.slane %v374_v17, 2  ;;  %v407_v24 = vrot.slane %v406_v20, 4  ;;  %v311_v25 = vrot.slane %v310_v18, 1 }
 0x115   : > { %v408_v28 = vadd.f32 %v407_v24, %v406_v20  ;;  %v312_v29 = vadd.f32 %v311_v25, %v310_v18  ;;  %v376_v30 = vadd.f32 %v375_v23, %v374_v17 }
 0x116   : > { %v433_v32 = vpop.xlane.xlu0 %432 }
 0x117   : > { %v409_v35 = vrot.slane %v408_v28, 2  ;;  %v434_v36 = vrot.slane %v433_v32, 4  ;;  %636 = vpush %v312_v29  ;;  %v377_v38 = vrot.slane %v376_v30, 1 }
 0x118   : > { %638 = vpush %v327_v33 }
 0x119   : > { %v435_v40 = vadd.f32 %v434_v36, %v433_v32  ;;  %640 = vpush %v344_v37  ;;  %v378_v41 = vadd.f32 %v377_v38, %v376_v30  ;;  %v410_v42 = vadd.f32 %v409_v35, %v408_v28 }
 0x11a   : > { %642 = vpush %v361_v39 }
 0x11b   : > { %v436_v45 = vrot.slane %v435_v40, 2  ;;  %644 = vpush %v378_v41  ;;  %v411_v46 = vrot.slane %v410_v42, 1 }
 0x11c   : > { %646 = vpush %v395_v43 }
 0x11d   : > { %v437_v47 = vadd.f32 %v436_v45, %v435_v40  ;;  %v412_v48 = vadd.f32 %v411_v46, %v410_v42 }
 0x11f   : > { %648 = vpush %v412_v48  ;;  %v438_v50 = vrot.slane %v437_v47, 1 }
 0x120   : > { %650 = vpush %v429_v49 }
 0x121   : > { %v439_v51 = vadd.f32 %v438_v50, %v437_v47 }
 0x123   : > { %652 = vpush %v439_v51 }
 0x148   : > { %s637_s24 = spop %636 }
 0x149   : > { %s639_s23 = spop %638  ;;  %v446_v54 = vstv %s637_s24  ;;  %s1109_s24 = scalar_lea.hbm %s1154_s3, %s629_s0 }
 0x14a   : > { %s641_s6 = spop %640  ;;  %v447_v58 = vsel %vm445_vm1, %v446_v54, 0.0 }
 0x14b   : > { %s346_s5 = sadd.f32 %s641_s6, %s639_s23  ;;  %s643_s30 = spop %642 }
 0x14c   : > { %s645_s7 = spop %644  ;;  %s460_s23 = scalar_lea.sflag [#allocation4], %s1056_s20 }
 0x14d   : > { %s363_s9 = sadd.f32 %s643_s30, %s346_s5  ;;  %s647_s8 = spop %646 }
 0x14e   : > { %s816_s6 = scalar_lea.vmem %s475_s19, 128  ;;  %s822_s5 = scalar_lea.vmem %s821_s14, 256 }
 0x14f   : > { %s380_s22 = sadd.f32 %s645_s7, %s363_s9  ;;  %p817_p8 = scmp.ne.s32.totalorder %s475_s19, %s816_s6 }
 0x150   : > { %s649_s1 = spop %648  ;;  %p824_p5 = scmp.lt.s32.totalorder %s822_s5, %s816_s6 }
 0x151   : > { %s397_s11 = sadd.f32 %s647_s8, %s380_s22  ;;  %s651_s28 = spop %650 }
 0x152   : > { %p818_p0 = pnand %p817_p8, %p983_p9  ;;  %p825_p6 = por %p824_p5, %p823_p4 }
 0x153   : > { %s414_s10 = sadd.f32 %s649_s1, %s397_s11 }
 0x154   : > { %s653_s21 = spop %652  ;;  %p819_p2 = pneg %p818_p0 }
 0x155   : > { %s431_s26 = sadd.f32 %s651_s28, %s414_s10  ;;  %v453_v57 = vstv %s653_s21 }
 0x156   : > { %v454_v61 = vsel %vm452_vm3, %v453_v57, 0.0  ;;  %p826_p7 = pnand %p825_p6, %p819_p2 }
 0x157   : > { %v449_v56 = vstv %s431_s26 }
 0x158   : > { %v450_v59 = vsel %vm448_vm2, %v449_v56, 0.0 }
 0x159   : > { %v451_v60 = vadd.f32 %v450_v59, %v447_v58 }
 0x15b   : > { %v455_v62 = vadd.f32 %v454_v61, %v451_v60 }
 0x15d   : > { %v457_v63 = vsel %vm456_vm4, %v455_v62, 0.0 }
 0x15e   : > { %458 = vst [vmem:[%s285_s4] sm:$0xff] %v457_v63 }
 0x15f   : > { %829 = shalt.err (!%p826_p7)
}
 0x160   : > { %s830_s30 = scalar_lea.hbm %s1109_s24, 128  ;;  %s834_s9 = scalar_lea.hbm %s1154_s3, 256 }
 0x161   : > { %p831_p1 = scmp.ne.s32.totalorder %s1109_s24, %s830_s30  ;;  %p835_p3 = scmp.lt.s32.totalorder %s1109_s24, %s1154_s3 }
 0x162   : > { %p836_p8 = scmp.lt.s32.totalorder %s834_s9, %s830_s30 }
 0x163   : > { %p832_p10 = pnand %p831_p1, %p983_p9 }
 0x164   : > { %p837_p0 = por %p836_p8, %p835_p3 }
 0x165   : > { %p833_p13 = pneg %p832_p10 }
 0x167   : > { %p838_p2 = pnand %p837_p0, %p833_p13 }
 0x169   : > { %841 = shalt.err (!%p838_p2)
}
 0x16a   : > { %660 = dma.vmem_to_hbm [thread:$0]  (%p983_p9), %s475_s19, 128, %s1109_s24, %s460_s23  }
 0x16b PF: > { %s486_s1 = sand.u32 1, %s880_s12   ;;  %p673_p4 = pnand %p604_p12, %p990_p11 }
 0x16c   : > { %s487_s11 = scalar_lea.sflag [#allocation4], %s486_s1 }
 0x16d   : > { %p674_p5 = pneg %p673_p4 }
 0x16f   : > { %875 = dma.done.wait (%p674_p5), %s487_s11, 128  }
 0x170   : > { %877 = vsyncadd (%p674_p5), %s487_s11, 4294967168  ;;  %s22_s17 = sadd.s32 1, %s900_s17   ;;  %s1171_s10 = sld [smem:[#allocation12_spill]] }
 0x171   : > { %p19_p6 = scmp.ge.s32.totalorder %s22_s17, 4   ;;  %s1172_s14 = sld [smem:[#allocation14_spill]] }
 0x172   : > { %s1173_s25 = sld [smem:[#allocation13_spill]]  ;;  %s1174_s12 = smov %s884_s13 }
 0x173   : > { %s1176_s15 = smov %s896_s16 }
 0x174   :  { %21 = sbr.rel (!%p19_p6) target bundleno = 11 (0xb), region = 114 }
 0x176   : > { %s1175_s13 = smov %s1171_s10 }
 0x178   : > { %s1177_s16 = smov %s1173_s25 }
 0x179   :  { %492 = vsyncpa [#allocation3], 1 }
 0x17a   :  { %494 = vsyncpa [#allocation3 + $0x1], 1 }
 0x17b   :  { %495 = vsyncpa [#allocation6], 1 }
 0x17c   :  { %497 = vsyncpa [#allocation6 + $0x1], 1 }
 0x17d   :  { %498 = vsyncpa [#allocation4], 1 }
 0x17e   :  { %500 = vsyncpa [#allocation4 + $0x1], 1 }

</bundles_post_ra>
